<compile_context>
chip_gen: v6e
topology: v6e:2x2x1
jax: 0.10.0
libtpu: 0.0.40
codegen_flags: <defaults>
</compile_context>

<pallas_src>
import functools
import math

import jax
import jax.numpy as jnp
import numpy as np
from jax import lax
from jax.experimental import pallas as pl
from jax.experimental.pallas import tpu as pltpu


# ----------------------------- Pallas kernel ------------------------------ #
def transformer_layer_kernel(*refs, num_heads, causal, eps=1e-5):
    if causal:
        (x_ref, wqkv_ref, wo_ref, w1_ref, w2_ref, lnp_ref,
         out_ref, score_ref) = refs
    else:
        (x_ref, mask_ref, wqkv_ref, wo_ref, w1_ref, w2_ref, lnp_ref,
         out_ref, score_ref) = refs

    x = x_ref[0]                                  # (S, E) f32
    S, E = x.shape
    H = num_heads
    D = E // H
    F = w1_ref.shape[1]
    inv_norm = 1.0 / math.sqrt(D)

    if causal:
        # Mask built in-kernel: saves B*S^2 bytes of HBM reads per layer.
        row = lax.broadcasted_iota(jnp.int32, (S, S), 0)
        col = lax.broadcasted_iota(jnp.int32, (S, S), 1)
        masked = col > row                         # (S, S) bool
    else:
        masked = mask_ref[0] != 0                  # (S, S) bool

    # Packed small params: rows = [b1, b2, g1, be1, g2, be2] (zero-padded to P).
    b1 = lnp_ref[0:1, :F]
    b2 = lnp_ref[1:2, :E]
    g1 = lnp_ref[2:3, :E]
    be1 = lnp_ref[3:4, :E]
    g2 = lnp_ref[4:5, :E]
    be2 = lnp_ref[5:6, :E]

    # ---- fused QKV projection: one full-depth matmul ----
    qkv = jnp.dot(x, wqkv_ref[...], preferred_element_type=jnp.float32)  # (S,3E)
    # Single head-major relayout for Q, K and V together.
    # TODO(synk): at production sizes produce a head-major QKV layout upstream
    # so this in-kernel transpose disappears entirely.
    qkv_h = jnp.swapaxes(qkv.reshape(S, 3 * H, D), 0, 1)                 # (3H,S,D)
    q = qkv_h[0:H]
    k = qkv_h[H:2 * H]
    v = qkv_h[2 * H:3 * H]

    # ---- head-batched attention ----
    s = jnp.einsum("hsd,htd->hst", q, k,
                   preferred_element_type=jnp.float32) * inv_norm        # (H,S,S)
    s = jnp.where(masked[None, :, :], -1e30, s)    # finite sentinel: NaN-safe
    s = s - jnp.max(s, axis=-1, keepdims=True)
    p = jnp.exp(s)
    # Exact normalization: the probabilities are a user-visible output.
    p = p * (1.0 / jnp.sum(p, axis=-1, keepdims=True))

    # TODO(synk): gate this store behind a flag / write bf16 at production S to
    # halve the dominant B*H*S^2 HBM write.
    score_ref[0] = p                                # lane-dense (H,S,S) store

    attn = jnp.einsum("hst,htd->hsd", p, v,
                      preferred_element_type=jnp.float32)                # (H,S,D)
    # Output projection: one relayout to (S, H*D) then a single full-depth
    # (S,E)@(E,E) matmul (no H shallow K=D matmuls, no VALU sum over heads).
    attn_cat = jnp.swapaxes(attn, 0, 1).reshape(S, E)                    # (S,E)
    mha = jnp.dot(attn_cat, wo_ref[...], preferred_element_type=jnp.float32)

    # ---- residual + LayerNorm 1 ----
    def layer_norm(y, g, b):
        mu = jnp.mean(y, axis=-1, keepdims=True)
        var = jnp.mean((y - mu) ** 2, axis=-1, keepdims=True)
        return (y - mu) * lax.rsqrt(var + eps) * g + b

    h1 = layer_norm(x + mha, g1, be1)                                    # (S,E)

    # ---- feedforward ----
    # TODO(synk): K-tile w1/w2 over F with a reduction grid axis at large F.
    ff = jnp.dot(h1, w1_ref[...], preferred_element_type=jnp.float32) + b1
    ff = jnp.maximum(ff, 0.0)                                            # ReLU
    ff = jnp.dot(ff, w2_ref[...], preferred_element_type=jnp.float32) + b2

    # ---- residual + LayerNorm 2 ----
    out_ref[0] = layer_norm(h1 + ff, g2, be2)


# ----------------------- host-side weight repacking ------------------------ #
def pack_params(params, *, num_heads):
    """Repack per-head torch-style weights into kernel-friendly fused layouts."""
    H = num_heads
    E = params["wq"].shape[1]
    F = params["w1"].shape[1]

    def heads_to_cols(w):          # (H, E, D) -> (E, H*D), head-major columns
        return jnp.transpose(w, (1, 0, 2)).reshape(E, H * (E // H))

    wqkv = jnp.concatenate(
        [heads_to_cols(params["wq"]),
         heads_to_cols(params["wk"]),
         heads_to_cols(params["wv"])], axis=1).astype(jnp.float32)      # (E,3E)

    # Coalesce the six tiny vectors into one (6, P) array (one DMA, one buffer).
    P = max(E, F)

    def pad_row(v):
        v = v.reshape(1, -1)
        return jnp.pad(v, ((0, 0), (0, P - v.shape[1])))

    lnp = jnp.concatenate(
        [pad_row(params["b1"]), pad_row(params["b2"]),
         pad_row(params["g1"]), pad_row(params["be1"]),
         pad_row(params["g2"]), pad_row(params["be2"])], axis=0)        # (6,P)

    return dict(
        wqkv=wqkv,
        wo=params["wo"].astype(jnp.float32),                            # (E,E)
        w1=params["w1"].astype(jnp.float32),
        w2=params["w2"].astype(jnp.float32),
        lnp=lnp.astype(jnp.float32),
    )


# ------------------------------ JAX wrapper -------------------------------- #
def transformer_layer(x, packed, *, num_heads, mask=None, causal=False):
    """x: (B,S,E) f32. Returns (out (B,S,E), scores (B,H,S,S)).

    Scores are head-major (B,H,S,S); PyTorch's stack(dim=-1) layout (B,S,S,H)
    is a transpose the consumer should fuse (avoids an extra HBM pass here).
    """
    B, S, E = x.shape
    H = num_heads
    F = packed["w1"].shape[1]
    P = packed["lnp"].shape[1]

    def full(shape):
        return pl.BlockSpec(shape, lambda b: (0,) * len(shape))

    kernel = functools.partial(transformer_layer_kernel,
                               num_heads=num_heads, causal=causal)

    in_specs = [pl.BlockSpec((1, S, E), lambda b: (b, 0, 0))]            # x
    operands = [x]
    if not causal:
        assert mask is not None
        in_specs.append(pl.BlockSpec((1, S, S), lambda b: (b, 0, 0)))    # mask
        operands.append(mask.astype(jnp.int8))
    in_specs += [
        full((E, 3 * E)),     # fused QKV weight
        full((E, E)),         # output projection weight
        full((E, F)),         # w1
        full((F, E)),         # w2
        full((6, P)),         # packed biases / LN params
    ]
    operands += [packed["wqkv"], packed["wo"], packed["w1"], packed["w2"],
                 packed["lnp"]]

    flops = 2 * B * S * E * (4 * E + 2 * S + 2 * F)
    bytes_accessed = 4 * (2 * B * S * E + B * H * S * S
                          + packed["wqkv"].size + packed["wo"].size
                          + packed["w1"].size + packed["w2"].size
                          + packed["lnp"].size)
    cost = pl.CostEstimate(flops=int(flops),
                           transcendentals=int(B * H * S * S),
                           bytes_accessed=int(bytes_accessed))

    out, scores = pl.pallas_call(
        kernel,
        out_shape=(
            jax.ShapeDtypeStruct((B, S, E), jnp.float32),
            jax.ShapeDtypeStruct((B, H, S, S), jnp.float32),
        ),
        grid_spec=pltpu.PrefetchScalarGridSpec(
            num_scalar_prefetch=0,
            grid=(B,),   # batch-parallel; constant-index-map weights are not
                         # re-DMA'd across grid steps
            in_specs=in_specs,
            out_specs=[
                pl.BlockSpec((1, S, E), lambda b: (b, 0, 0)),
                pl.BlockSpec((1, H, S, S), lambda b: (b, 0, 0, 0)),
            ],
        ),
        compiler_params=pltpu.CompilerParams(
            dimension_semantics=("parallel",),
            # Explicit budget (re-derive for v7x's 64 MiB physical VMEM).
            vmem_limit_bytes=32 * 1024 * 1024),
        cost_estimate=cost,
    )(*operands)
    return out, scores


# -------------------------- pure-JAX reference ------------------------------ #
def transformer_layer_ref(x, packed, *, num_heads, mask=None, causal=False,
                          eps=1e-5):
    B, S, E = x.shape
    H = num_heads
    D = E // H
    F = packed["w1"].shape[1]

    if causal:
        mask_b = jnp.triu(jnp.ones((S, S), jnp.bool_), k=1)[None, :, :]
    else:
        mask_b = mask != 0

    qkv = jnp.einsum("bse,ef->bsf", x, packed["wqkv"])                   # (B,S,3E)

    def heads(block):   # (B,S,E) -> (B,H,S,D)
        return jnp.swapaxes(block.reshape(B, S, H, D), 1, 2)

    q = heads(qkv[..., 0 * E:1 * E])
    k = heads(qkv[..., 1 * E:2 * E])
    v = heads(qkv[..., 2 * E:3 * E])

    s = jnp.einsum("bhsd,bhtd->bhst", q, k) / math.sqrt(D)
    s = jnp.where(mask_b[:, None], -1e30, s)
    s = s - s.max(-1, keepdims=True)
    p = jnp.exp(s)
    p = p / p.sum(-1, keepdims=True)

    attn = jnp.einsum("bhst,bhtd->bhsd", p, v)
    attn_cat = jnp.swapaxes(attn, 1, 2).reshape(B, S, E)
    mha = jnp.einsum("bse,ef->bsf", attn_cat, packed["wo"])

    b1 = packed["lnp"][0, :F]
    b2 = packed["lnp"][1, :E]
    g1 = packed["lnp"][2, :E]
    be1 = packed["lnp"][3, :E]
    g2 = packed["lnp"][4, :E]
    be2 = packed["lnp"][5, :E]

    def ln(y, g, b):
        mu = jnp.mean(y, axis=-1, keepdims=True)
        var = jnp.mean((y - mu) ** 2, axis=-1, keepdims=True)
        return (y - mu) / jnp.sqrt(var + eps) * g + b

    h1 = ln(x + mha, g1, be1)
    ff = jnp.einsum("bse,ef->bsf", h1, packed["w1"]) + b1
    ff = jnp.maximum(ff, 0.0)
    ff = jnp.einsum("bsf,fe->bse", ff, packed["w2"]) + b2
    out = ln(h1 + ff, g2, be2)
    return out, p


# --------------------------------- main ------------------------------------ #
if __name__ == "__main__":
    B, S, E, H, F = 2, 8, 32, 4, 64
    D = E // H

    key = jax.random.PRNGKey(0)
    keys = jax.random.split(key, 10)

    def xavier(k, shape, fan_in, fan_out):
        limit = math.sqrt(6.0 / (fan_in + fan_out))
        return jax.random.uniform(k, shape, jnp.float32, -limit, limit)

    # Weights stored pre-transposed so the math is x @ W (== nn.Linear x @ W^T).
    params = {
        "wq": xavier(keys[0], (H, E, D), E, D),
        "wk": xavier(keys[1], (H, E, D), E, D),
        "wv": xavier(keys[2], (H, E, D), E, D),
        "wo": xavier(keys[3], (E, E), E, E),
        "w1": xavier(keys[4], (E, F), E, F),
        "b1": jax.random.uniform(keys[7], (F,), jnp.float32, -0.1, 0.1),
        "w2": xavier(keys[5], (F, E), F, E),
        "b2": jax.random.uniform(keys[8], (E,), jnp.float32, -0.1, 0.1),
        "g1": jnp.ones((E,), jnp.float32),
        "be1": jnp.zeros((E,), jnp.float32),
        "g2": jnp.ones((E,), jnp.float32),
        "be2": jnp.zeros((E,), jnp.float32),
    }
    packed = pack_params(params, num_heads=H)

    x = jax.random.normal(keys[6], (B, S, E), jnp.float32)

    # Causal masking is generated in-kernel (no (B,S,S) mask DMA).
    out, scores = transformer_layer(x, packed, num_heads=H, causal=True)
    jax.block_until_ready(out)
    jax.block_until_ready(scores)

    out_ref, scores_ref = transformer_layer_ref(x, packed, num_heads=H,
                                                causal=True)
    np.testing.assert_allclose(np.asarray(out), np.asarray(out_ref),
                               rtol=2e-2, atol=2e-2)
    np.testing.assert_allclose(np.asarray(scores), np.asarray(scores_ref),
                               rtol=1e-2, atol=2e-3)

    print("KERNEL_OK")
</pallas_src>

<mosaic_0001>
module attributes {stable_mosaic.version = 11 : i64} {
  func.func @transformer_layer_kernel(%arg0: i32, %arg1: memref<1x8x32xf32, #tpu.memory_space<vmem>>, %arg2: memref<32x96xf32, #tpu.memory_space<vmem>>, %arg3: memref<32x32xf32, #tpu.memory_space<vmem>>, %arg4: memref<32x64xf32, #tpu.memory_space<vmem>>, %arg5: memref<64x32xf32, #tpu.memory_space<vmem>>, %arg6: memref<6x64xf32, #tpu.memory_space<vmem>>, %arg7: memref<1x8x32xf32, #tpu.memory_space<vmem>>, %arg8: memref<1x4x8x8xf32, #tpu.memory_space<vmem>>) attributes {dimension_semantics = [#tpu.dimension_semantics<parallel>], iteration_bounds = array<i64: 2>, scalar_prefetch = 0 : i64, scratch_operands = 0 : i64, tpu.core_type = #tpu.core_type<tc>, window_params = [{transform_indices = @transform_0, window_bounds = array<i64: 1, 8, 32>}, {pipeline_mode = #tpu.pipeline_mode<synchronous>, transform_indices = @transform_1, window_bounds = array<i64: 32, 96>}, {pipeline_mode = #tpu.pipeline_mode<synchronous>, transform_indices = @transform_2, window_bounds = array<i64: 32, 32>}, {pipeline_mode = #tpu.pipeline_mode<synchronous>, transform_indices = @transform_3, window_bounds = array<i64: 32, 64>}, {pipeline_mode = #tpu.pipeline_mode<synchronous>, transform_indices = @transform_4, window_bounds = array<i64: 64, 32>}, {pipeline_mode = #tpu.pipeline_mode<synchronous>, transform_indices = @transform_5, window_bounds = array<i64: 6, 64>}, {transform_indices = @transform_6, window_bounds = array<i64: 1, 8, 32>}, {transform_indices = @transform_7, window_bounds = array<i64: 1, 4, 8, 8>}]} {
    %c0 = arith.constant 0 : index
    %c0_0 = arith.constant 0 : index
    %c0_1 = arith.constant 0 : index
    %0 = vector.load %arg1[%c0, %c0_0, %c0_1] : memref<1x8x32xf32, #tpu.memory_space<vmem>>, vector<1x8x32xf32>
    %1 = vector.shape_cast %0 : vector<1x8x32xf32> to vector<8x32xf32>
    %2 = tpu.iota {dimensions = array<i32: 0>} : vector<8x8xi32>
    %3 = tpu.iota {dimensions = array<i32: 1>} : vector<8x8xi32>
    %4 = arith.cmpi sgt, %3, %2 : vector<8x8xi32>
    %c0_2 = arith.constant 0 : index
    %c0_3 = arith.constant 0 : index
    %5 = vector.load %arg6[%c0_2, %c0_3] : memref<6x64xf32, #tpu.memory_space<vmem>>, vector<1x64xf32>
    %c1 = arith.constant 1 : index
    %c0_4 = arith.constant 0 : index
    %6 = vector.load %arg6[%c1, %c0_4] : memref<6x64xf32, #tpu.memory_space<vmem>>, vector<1x32xf32>
    %c2 = arith.constant 2 : index
    %c0_5 = arith.constant 0 : index
    %7 = vector.load %arg6[%c2, %c0_5] : memref<6x64xf32, #tpu.memory_space<vmem>>, vector<1x32xf32>
    %c3 = arith.constant 3 : index
    %c0_6 = arith.constant 0 : index
    %8 = vector.load %arg6[%c3, %c0_6] : memref<6x64xf32, #tpu.memory_space<vmem>>, vector<1x32xf32>
    %c4 = arith.constant 4 : index
    %c0_7 = arith.constant 0 : index
    %9 = vector.load %arg6[%c4, %c0_7] : memref<6x64xf32, #tpu.memory_space<vmem>>, vector<1x32xf32>
    %c5 = arith.constant 5 : index
    %c0_8 = arith.constant 0 : index
    %10 = vector.load %arg6[%c5, %c0_8] : memref<6x64xf32, #tpu.memory_space<vmem>>, vector<1x32xf32>
    %c0_9 = arith.constant 0 : index
    %c0_10 = arith.constant 0 : index
    %11 = vector.load %arg2[%c0_9, %c0_10] : memref<32x96xf32, #tpu.memory_space<vmem>>, vector<32x96xf32>
    %cst = arith.constant dense<0.000000e+00> : vector<8x96xf32>
    %12 = tpu.matmul %1, %11, %cst {dimension_numbers = #tpu.dot_dimension_numbers<[1], [0], [0], [1], [0, 0, 1, 1], [], []>} : vector<8x32xf32>, vector<32x96xf32>, vector<8x96xf32> -> vector<8x96xf32>
    %13 = vector.shape_cast %12 : vector<8x96xf32> to vector<8x12x8xf32>
    %14 = tpu.transpose %13, [1, 0, 2] : vector<8x12x8xf32> -> vector<12x8x8xf32>
    %15 = vector.extract_strided_slice %14 {offsets = [0, 0, 0], sizes = [4, 8, 8], strides = [1, 1, 1]} : vector<12x8x8xf32> to vector<4x8x8xf32>
    %16 = vector.extract_strided_slice %14 {offsets = [4, 0, 0], sizes = [4, 8, 8], strides = [1, 1, 1]} : vector<12x8x8xf32> to vector<4x8x8xf32>
    %17 = vector.extract_strided_slice %14 {offsets = [8, 0, 0], sizes = [4, 8, 8], strides = [1, 1, 1]} : vector<12x8x8xf32> to vector<4x8x8xf32>
    "tpu.trace_start"() <{level = 10 : i32, message = "hsd,htd->hst"}> : () -> ()
    %cst_11 = arith.constant dense<0.000000e+00> : vector<4x8x8xf32>
    %18 = tpu.matmul %15, %16, %cst_11 {dimension_numbers = #tpu.dot_dimension_numbers<[2], [2], [1], [1], [0, 0, 0, 1, 1, 1], [0], [0]>} : vector<4x8x8xf32>, vector<4x8x8xf32>, vector<4x8x8xf32> -> vector<4x8x8xf32>
    "tpu.trace_stop"() : () -> ()
    %cst_12 = arith.constant 0.353553385 : f32
    %19 = vector.broadcast %cst_12 : f32 to vector<4x8x8xf32>
    %20 = arith.mulf %18, %19 : vector<4x8x8xf32>
    %21 = vector.shape_cast %4 : vector<8x8xi1> to vector<1x8x8xi1>
    %cst_13 = arith.constant -1.000000e+30 : f32
    %22 = vector.shape_cast %21 : vector<1x8x8xi1> to vector<1x8x8xi1>
    %23 = vector.broadcast %22 : vector<1x8x8xi1> to vector<4x8x8xi1>
    %24 = vector.broadcast %cst_13 : f32 to vector<4x8x8xf32>
    %25 = arith.select %23, %24, %20 : vector<4x8x8xi1>, vector<4x8x8xf32>
    %cst_14 = arith.constant dense<0xFF800000> : vector<4x8xf32>
    %26 = vector.multi_reduction <maximumf>, %25, %cst_14 [2] : vector<4x8x8xf32> to vector<4x8xf32>
    %27 = vector.shape_cast %26 : vector<4x8xf32> to vector<4x8x1xf32>
    %28 = vector.broadcast %27 : vector<4x8x1xf32> to vector<4x8x8xf32>
    %29 = arith.subf %25, %28 : vector<4x8x8xf32>
    %30 = math.exp %29 : vector<4x8x8xf32>
    %cst_15 = arith.constant dense<0.000000e+00> : vector<4x8xf32>
    %31 = vector.multi_reduction <add>, %30, %cst_15 [2] : vector<4x8x8xf32> to vector<4x8xf32>
    %32 = vector.shape_cast %31 : vector<4x8xf32> to vector<4x8x1xf32>
    %cst_16 = arith.constant 1.000000e+00 : f32
    %33 = vector.broadcast %cst_16 : f32 to vector<4x8x1xf32>
    %34 = arith.divf %33, %32 : vector<4x8x1xf32>
    %35 = vector.broadcast %34 : vector<4x8x1xf32> to vector<4x8x8xf32>
    %36 = arith.mulf %30, %35 : vector<4x8x8xf32>
    %c0_17 = arith.constant 0 : index
    %c0_18 = arith.constant 0 : index
    %c0_19 = arith.constant 0 : index
    %c0_20 = arith.constant 0 : index
    %37 = vector.load %arg8[%c0_17, %c0_18, %c0_19, %c0_20] : memref<1x4x8x8xf32, #tpu.memory_space<vmem>>, vector<1x4x8x8xf32>
    %38 = vector.shape_cast %37 : vector<1x4x8x8xf32> to vector<4x8x8xf32>
    %39 = vector.shape_cast %36 : vector<4x8x8xf32> to vector<1x4x8x8xf32>
    tpu.vector_store %arg8[%c0_17, %c0_18, %c0_19, %c0_20], %39 {strides = array<i32>} : memref<1x4x8x8xf32, #tpu.memory_space<vmem>>, vector<1x4x8x8xf32>,
    "tpu.trace_start"() <{level = 10 : i32, message = "hst,htd->hsd"}> : () -> ()
    %cst_21 = arith.constant dense<0.000000e+00> : vector<4x8x8xf32>
    %40 = tpu.matmul %36, %17, %cst_21 {dimension_numbers = #tpu.dot_dimension_numbers<[2], [1], [1], [2], [0, 0, 0, 1, 1, 2], [0], [0]>} : vector<4x8x8xf32>, vector<4x8x8xf32>, vector<4x8x8xf32> -> vector<4x8x8xf32>
    "tpu.trace_stop"() : () -> ()
    %41 = tpu.transpose %40, [1, 0, 2] : vector<4x8x8xf32> -> vector<8x4x8xf32>
    %42 = vector.shape_cast %41 : vector<8x4x8xf32> to vector<8x32xf32>
    %c0_22 = arith.constant 0 : index
    %c0_23 = arith.constant 0 : index
    %43 = vector.load %arg3[%c0_22, %c0_23] : memref<32x32xf32, #tpu.memory_space<vmem>>, vector<32x32xf32>
    %cst_24 = arith.constant dense<0.000000e+00> : vector<8x32xf32>
    %44 = tpu.matmul %42, %43, %cst_24 {dimension_numbers = #tpu.dot_dimension_numbers<[1], [0], [0], [1], [0, 0, 1, 1], [], []>} : vector<8x32xf32>, vector<32x32xf32>, vector<8x32xf32> -> vector<8x32xf32>
    %45 = arith.addf %1, %44 : vector<8x32xf32>
    %cst_25 = arith.constant dense<0.000000e+00> : vector<8xf32>
    %46 = vector.multi_reduction <add>, %45, %cst_25 [1] : vector<8x32xf32> to vector<8xf32>
    %47 = vector.shape_cast %46 : vector<8xf32> to vector<8x1xf32>
    %cst_26 = arith.constant 3.200000e+01 : f32
    %48 = vector.broadcast %cst_26 : f32 to vector<8x1xf32>
    %49 = arith.divf %47, %48 : vector<8x1xf32>
    %50 = vector.broadcast %49 : vector<8x1xf32> to vector<8x32xf32>
    %51 = arith.subf %45, %50 : vector<8x32xf32>
    %52 = arith.mulf %51, %51 : vector<8x32xf32>
    %cst_27 = arith.constant dense<0.000000e+00> : vector<8xf32>
    %53 = vector.multi_reduction <add>, %52, %cst_27 [1] : vector<8x32xf32> to vector<8xf32>
    %54 = vector.shape_cast %53 : vector<8xf32> to vector<8x1xf32>
    %cst_28 = arith.constant 3.200000e+01 : f32
    %55 = vector.broadcast %cst_28 : f32 to vector<8x1xf32>
    %56 = arith.divf %54, %55 : vector<8x1xf32>
    %57 = vector.broadcast %49 : vector<8x1xf32> to vector<8x32xf32>
    %58 = arith.subf %45, %57 : vector<8x32xf32>
    %cst_29 = arith.constant 9.99999974E-6 : f32
    %59 = vector.broadcast %cst_29 : f32 to vector<8x1xf32>
    %60 = arith.addf %56, %59 : vector<8x1xf32>
    %61 = math.rsqrt %60 : vector<8x1xf32>
    %62 = vector.broadcast %61 : vector<8x1xf32> to vector<8x32xf32>
    %63 = arith.mulf %58, %62 : vector<8x32xf32>
    %64 = vector.broadcast %7 : vector<1x32xf32> to vector<8x32xf32>
    %65 = arith.mulf %63, %64 : vector<8x32xf32>
    %66 = vector.broadcast %8 : vector<1x32xf32> to vector<8x32xf32>
    %67 = arith.addf %65, %66 : vector<8x32xf32>
    %c0_30 = arith.constant 0 : index
    %c0_31 = arith.constant 0 : index
    %68 = vector.load %arg4[%c0_30, %c0_31] : memref<32x64xf32, #tpu.memory_space<vmem>>, vector<32x64xf32>
    %cst_32 = arith.constant dense<0.000000e+00> : vector<8x64xf32>
    %69 = tpu.matmul %67, %68, %cst_32 {dimension_numbers = #tpu.dot_dimension_numbers<[1], [0], [0], [1], [0, 0, 1, 1], [], []>} : vector<8x32xf32>, vector<32x64xf32>, vector<8x64xf32> -> vector<8x64xf32>
    %70 = vector.broadcast %5 : vector<1x64xf32> to vector<8x64xf32>
    %71 = arith.addf %69, %70 : vector<8x64xf32>
    %cst_33 = arith.constant 0.000000e+00 : f32
    %72 = vector.broadcast %cst_33 : f32 to vector<8x64xf32>
    %73 = arith.maximumf %71, %72 : vector<8x64xf32>
    %c0_34 = arith.constant 0 : index
    %c0_35 = arith.constant 0 : index
    %74 = vector.load %arg5[%c0_34, %c0_35] : memref<64x32xf32, #tpu.memory_space<vmem>>, vector<64x32xf32>
    %cst_36 = arith.constant dense<0.000000e+00> : vector<8x32xf32>
    %75 = tpu.matmul %73, %74, %cst_36 {dimension_numbers = #tpu.dot_dimension_numbers<[1], [0], [0], [1], [0, 0, 1, 1], [], []>} : vector<8x64xf32>, vector<64x32xf32>, vector<8x32xf32> -> vector<8x32xf32>
    %76 = vector.broadcast %6 : vector<1x32xf32> to vector<8x32xf32>
    %77 = arith.addf %75, %76 : vector<8x32xf32>
    %78 = arith.addf %67, %77 : vector<8x32xf32>
    %cst_37 = arith.constant dense<0.000000e+00> : vector<8xf32>
    %79 = vector.multi_reduction <add>, %78, %cst_37 [1] : vector<8x32xf32> to vector<8xf32>
    %80 = vector.shape_cast %79 : vector<8xf32> to vector<8x1xf32>
    %cst_38 = arith.constant 3.200000e+01 : f32
    %81 = vector.broadcast %cst_38 : f32 to vector<8x1xf32>
    %82 = arith.divf %80, %81 : vector<8x1xf32>
    %83 = vector.broadcast %82 : vector<8x1xf32> to vector<8x32xf32>
    %84 = arith.subf %78, %83 : vector<8x32xf32>
    %85 = arith.mulf %84, %84 : vector<8x32xf32>
    %cst_39 = arith.constant dense<0.000000e+00> : vector<8xf32>
    %86 = vector.multi_reduction <add>, %85, %cst_39 [1] : vector<8x32xf32> to vector<8xf32>
    %87 = vector.shape_cast %86 : vector<8xf32> to vector<8x1xf32>
    %cst_40 = arith.constant 3.200000e+01 : f32
    %88 = vector.broadcast %cst_40 : f32 to vector<8x1xf32>
    %89 = arith.divf %87, %88 : vector<8x1xf32>
    %90 = vector.broadcast %82 : vector<8x1xf32> to vector<8x32xf32>
    %91 = arith.subf %78, %90 : vector<8x32xf32>
    %cst_41 = arith.constant 9.99999974E-6 : f32
    %92 = vector.broadcast %cst_41 : f32 to vector<8x1xf32>
    %93 = arith.addf %89, %92 : vector<8x1xf32>
    %94 = math.rsqrt %93 : vector<8x1xf32>
    %95 = vector.broadcast %94 : vector<8x1xf32> to vector<8x32xf32>
    %96 = arith.mulf %91, %95 : vector<8x32xf32>
    %97 = vector.broadcast %9 : vector<1x32xf32> to vector<8x32xf32>
    %98 = arith.mulf %96, %97 : vector<8x32xf32>
    %99 = vector.broadcast %10 : vector<1x32xf32> to vector<8x32xf32>
    %100 = arith.addf %98, %99 : vector<8x32xf32>
    %c0_42 = arith.constant 0 : index
    %c0_43 = arith.constant 0 : index
    %c0_44 = arith.constant 0 : index
    %101 = vector.load %arg7[%c0_42, %c0_43, %c0_44] : memref<1x8x32xf32, #tpu.memory_space<vmem>>, vector<1x8x32xf32>
    %102 = vector.shape_cast %101 : vector<1x8x32xf32> to vector<8x32xf32>
    %103 = vector.shape_cast %100 : vector<8x32xf32> to vector<1x8x32xf32>
    tpu.vector_store %arg7[%c0_42, %c0_43, %c0_44], %103 {strides = array<i32>} : memref<1x8x32xf32, #tpu.memory_space<vmem>>, vector<1x8x32xf32>,
    return
  }
  func.func @transform_0(%arg0: i32) -> (i32, i32, i32) {
    %c0_i32 = arith.constant 0 : i32
    %c0_i32_0 = arith.constant 0 : i32
    %c0_i32_1 = arith.constant 0 : i32
    return %arg0, %c0_i32, %c0_i32_0 : i32, i32, i32
  }
  func.func @transform_1(%arg0: i32) -> (i32, i32) {
    %c0_i32 = arith.constant 0 : i32
    %c0_i32_0 = arith.constant 0 : i32
    %c0_i32_1 = arith.constant 0 : i32
    return %c0_i32, %c0_i32_0 : i32, i32
  }
  func.func @transform_2(%arg0: i32) -> (i32, i32) {
    %c0_i32 = arith.constant 0 : i32
    %c0_i32_0 = arith.constant 0 : i32
    %c0_i32_1 = arith.constant 0 : i32
    return %c0_i32, %c0_i32_0 : i32, i32
  }
  func.func @transform_3(%arg0: i32) -> (i32, i32) {
    %c0_i32 = arith.constant 0 : i32
    %c0_i32_0 = arith.constant 0 : i32
    %c0_i32_1 = arith.constant 0 : i32
    return %c0_i32, %c0_i32_0 : i32, i32
  }
  func.func @transform_4(%arg0: i32) -> (i32, i32) {
    %c0_i32 = arith.constant 0 : i32
    %c0_i32_0 = arith.constant 0 : i32
    %c0_i32_1 = arith.constant 0 : i32
    return %c0_i32, %c0_i32_0 : i32, i32
  }
  func.func @transform_5(%arg0: i32) -> (i32, i32) {
    %c0_i32 = arith.constant 0 : i32
    %c0_i32_0 = arith.constant 0 : i32
    %c0_i32_1 = arith.constant 0 : i32
    return %c0_i32, %c0_i32_0 : i32, i32
  }
  func.func @transform_6(%arg0: i32) -> (i32, i32, i32) {
    %c0_i32 = arith.constant 0 : i32
    %c0_i32_0 = arith.constant 0 : i32
    %c0_i32_1 = arith.constant 0 : i32
    return %arg0, %c0_i32, %c0_i32_0 : i32, i32, i32
  }
  func.func @transform_7(%arg0: i32) -> (i32, i32, i32, i32) {
    %c0_i32 = arith.constant 0 : i32
    %c0_i32_0 = arith.constant 0 : i32
    %c0_i32_1 = arith.constant 0 : i32
    %c0_i32_2 = arith.constant 0 : i32
    return %arg0, %c0_i32, %c0_i32_0, %c0_i32_1 : i32, i32, i32, i32
  }
}

</mosaic_0001>

<bundles_post_ra>
// kernel: tpu_custom_call.1
= control target key start
LH: loop header
LB: loop body
LE: loop exit
PB: predicated region body
PF: predicated region fallthrough
CT: control target
= control target key end

     0   :  { %13 = vsyncpa [#allocation3], 0  ;;  %s2991_s0 = inlined_call_operand.hbm [shape: f32[2,8,32], index: 0, kind: input, shape index: {}]   ;;  %s2992_s1 = inlined_call_operand.vmem [shape: f32[32,96], index: 1, kind: input, shape index: {}]   ;;  %s2993_s2 = inlined_call_operand.vmem [shape: f32[32,32], index: 2, kind: input, shape index: {}]   ;;  %s2994_s3 = inlined_call_operand.vmem [shape: f32[32,64], index: 3, kind: input, shape index: {}]   ;;  %s2995_s4 = inlined_call_operand.vmem [shape: f32[64,32], index: 4, kind: input, shape index: {}]   ;;  %s2996_s5 = inlined_call_operand.vmem [shape: f32[6,64], index: 5, kind: input, shape index: {}]   ;;  %s2997_s6 = inlined_call_operand.hbm [shape: f32[2,8,32], index: 6, kind: output, shape index: {0}]   ;;  %s2998_s7 = inlined_call_operand.hbm [shape: f32[2,4,8,8], index: 7, kind: output, shape index: {1}]  }
   0x1   :  { %15 = vsyncpa [#allocation3 + $0x1], 0 }
   0x2   :  { %16 = vsyncpa [#allocation4], 0 }
   0x3   :  { %18 = vsyncpa [#allocation4 + $0x1], 0 }
   0x4   :  { %19 = vsyncpa [#allocation7], 0 }
   0x5   :  { %21 = vsyncpa [#allocation7 + $0x1], 0  ;;  %s2540_s24 = smov 0   ;;  %s2542_s25 = smov 0  }
   0x6   :  { %s2544_s26 = smov 0   ;;  %s2546_s27 = smov 0  }
   0x7 LB: > { %s2561_s28 = sadd.s32 4294967295, %s2476_s27   ;;  %s2081_s29 = sadd.s32 4294967294, %s2476_s27   ;;  %s2476_s27 = sphi %s2546_s27, %s3017_s27   ;;  %s2472_s26 = sphi %s2544_s26, %s3016_s26   ;;  %s2468_s25 = sphi %s2542_s25, %s3015_s25   ;;  %s2464_s24 = sphi %s2540_s24, %s3014_s24  }
   0x8   : > { %s2565_s30 = sadd.s32 1, %s2476_s27   ;;  %s34_s8 = sadd.s32 1, %s2472_s26 }
   0x9   : > { %s31_s9 = ssub.s32 %s2476_s27, %s2565_s30  ;;  %p41_p0 = scmp.ne.s32.totalorder %s2472_s26, %s2468_s25 }
   0xa   : > { %p32_p1 = scmp.eq.s32.totalorder %s31_s9, 0  ;;  %p42_p2 = scmp.eq.s32.totalorder %s2476_s27, 0 }
   0xb   : > { %p47_p3 = scmp.ne.s32.totalorder %s2468_s25, %s2464_s24  ;;  %p48_p4 = scmp.eq.s32.totalorder %s2561_s28, 0 }
   0xc   : > { %s2577_s10 = scalar_select %p32_p1, %s2472_s26, %s34_s8  }
   0xd   : > { %p2579_p5 = por %p42_p2, %p41_p0  ;;  %p2583_p6 = por %p48_p4, %p47_p3 }
   0xe   : > { %p176_p7 = scmp.eq.s32.totalorder %s2561_s28, 1  ;;  %p182_p8 = scmp.eq.s32.totalorder %s2081_s29, 1 }
   0xf   : > { %s3003_s12 = scalar_select %p2583_p6, 1, 0 }
  0x10   : > { %p2281_p10 = scmp.lt.s32.totalorder %s2476_s27, 2  ;;  %p2590_p11 = por %p176_p7, %p41_p0 }
  0x11   : > { %p2594_p12 = por %p182_p8, %p47_p3  ;;  %s243_s15 = sand.u32 1, %s2472_s26  }
  0x12   : > { %s3004_s13 = scalar_select %p2590_p11, 1, 0 }
  0x13   : > { %s3005_s14 = scalar_select %p2594_p12, 1, 0 }
  0x14   : > { %s2085_s16 = sshll.u32 %s2476_s27, 7  ;;  %s2084_s17 = sshll.u32 %s243_s15, 3 }
  0x15   : > { %s2603_s20 = scalar_lea.hbm %s2991_s0, %s2085_s16  ;;  %s247_s21 = scalar_lea.vmem [#allocation2], %s2084_s17 }
  0x16   : > { %s254_s22 = sshll.u32 %s247_s21, 4  ;;  %p2607_p13 = pnand %p2281_p10, %p2579_p5  ;;  %s2611_s22 = int_to_ptr.vmem [resolvable:$true] %s254_s22 }
  0x17   : > { %s244_s29 = scalar_lea.sflag [#allocation3], %s243_s15  ;;  %s2354_s8 = scalar_lea.hbm %s2603_s20, 128 }
  0x18   : > { %p2355_p2 = scmp.ne.s32.totalorder %s2603_s20, %s2354_s8  ;;  %p2356_p3 = pneg %p2607_p13 }
  0x19   : > { %s2359_s11 = scalar_lea.hbm %s2991_s0, 256  ;;  %p2360_p5 = scmp.lt.s32.totalorder %s2603_s20, %s2991_s0 }
  0x1a   : > { %p2357_p4 = pnand %p2356_p3, %p2355_p2  ;;  %p2361_p8 = scmp.lt.s32.totalorder %s2359_s11, %s2354_s8 }
  0x1c   : > { %p2358_p7 = pneg %p2357_p4  ;;  %p2362_p10 = por %p2361_p8, %p2360_p5 }
  0x1e   : > { %p2363_p9 = pnand %p2362_p10, %p2358_p7 }
  0x20   : > { %2366 = shalt.err (!%p2363_p9)
}
  0x21   : > { %s2367_s15 = scalar_lea.vmem %s2611_s22, 128  ;;  %s2478_s19 = smov [#allocation2]  }
  0x22   : > { %p2368_p0 = scmp.ne.s32.totalorder %s2611_s22, %s2367_s15  ;;  %s2372_s21 = sshll.u32 %s2478_s19, 4  ;;  %s2373_s21 = int_to_ptr.vmem [resolvable:$false] %s2372_s21 }
  0x23   : > { %s2374_s9 = scalar_lea.vmem %s2373_s21, 256  ;;  %p2375_p4 = scmp.lt.s32.totalorder %s2611_s22, %s2373_s21 }
  0x24   : > { %p2370_p1 = pnand %p2368_p0, %p2356_p3  ;;  %p2376_p12 = scmp.lt.s32.totalorder %s2374_s9, %s2367_s15 }
  0x26   : > { %p2371_p2 = pneg %p2370_p1  ;;  %p2377_p11 = por %p2376_p12, %p2375_p4 }
  0x28   : > { %p2378_p6 = pnand %p2377_p11, %p2371_p2 }
  0x2a   : > { %2381 = shalt.err (!%p2378_p6)
}
  0x2b   : > { %2273 = dma.hbm_to_vmem [thread:$0]  (!%p2607_p13), %s2603_s20, 128, %s2611_s22, %s244_s29  }
  0x2c   : > { %p3007_p9 = scmp.lt.s32.totalorder %s2476_s27, 3  ;;  %p3008_p7 = scmp.ge.s32.totalorder %s2476_s27, 1 }
  0x2e   : > { %p260_p0 = pnand %p3008_p7, %p3007_p9 }
  0x2f   : > { %s2638_s8 = sand.u32 (!%p260_p0), 1, %s2468_s25   ;;  %p3009_p6 = scmp.ne.s32.totalorder (!%p260_p0), %s3003_s12, 0 }
  0x30   : > { %263 = sbr.rel (%p260_p0) target bundleno = 2480 (0x9b0), region = 44  ;;  %s3001_s16 = sshll.u32 (!%p260_p0), %s2638_s8, 3 }
  0x31   : > { %s266_s11 = scalar_lea.sflag (!%p260_p0), [#allocation3], %s2638_s8  ;;  %s269_s23 = scalar_lea.vmem (!%p260_p0), [#allocation2], %s3001_s16 }
  0x35   : > { %2451 = dma.done.wait (%p3009_p6), %s266_s11, 128  }
  0x36   : > { %2453 = vsyncadd (%p3009_p6), %s266_s11, 4294967168  ;;  %v2479_v0 = vmov 0.0   ;;  %vm2480_vm0 = vmmov 0   ;;  %v320_v1 = vld [vmem:[%s2992_s1 + $0x18] sm:$0xff]  ;;  %v319_v2 = vld [vmem:[%s2992_s1 + $0x10] sm:$0xff]  ;;  %vm321_vm1 = vcmask 261120   ;;  %v306_v8 = vlaneseq }
  0x37   : > { %2172 = vmatprep.subr.mxu1 %v2479_v0  ;;  %2180 = vmatprep.mubr.msk.f32.mxu1 %vm2480_vm0, %v2479_v0  ;;  %v318_v3 = vld [vmem:[%s2992_s1 + $0x8] sm:$0xff]  ;;  %v317_v4 = vld [vmem:[%s2992_s1] sm:$0xff]  ;;  %s2481_s21 = smov 80   ;;  %s2482_s9 = smov 96   ;;  %v2488_v9 = vmov 1983009808  }
  0x38   : > { %2193 = vmatprep.subr.mxu0 %v2479_v0  ;;  %2195 = vmatprep.mubr.msk.f32.mxu0 %vm2480_vm0, %v2479_v0  ;;  %v2668_v5 = vld [vmem:[%s269_s23] sm:$0xff]  ;;  %s2483_s11 = smov 72   ;;  %s2484_s23 = smov 88   ;;  %v432_v10 = vunpack.c.l.s4 %v2488_v9  ;;  %v2489_v11 = vmov 1934713408   ;;  %v2686_v13 = vshrl.u32 %v306_v8, 7 }
  0x39   : > { %2173 = vmatpush3.msra.mxu1 %v320_v1  ;;  %s2485_s20 = smov 112   ;;  %s2486_s22 = smov 120   ;;  %v496_v12 = vunpack.c.l.s4 %v2489_v11  ;;  %vm837_vm2 = vcmask 64512   ;;  %vm1645_vm4 = vcmask 130048   ;;  %vm1647_vm5 = vcmask 195584  }
  0x3a   : > { %2174 = vmatprep.subr.mxu1 %v2479_v0  ;;  %s2487_s29 = smov 104   ;;  %v433_v14 = vunpack.c.0.s8 %v432_v10  ;;  %s2490_s17 = smov 56   ;;  %vm1845_vm6 = vcmask 523264  }
  0x3b   : > { %2175 = vmatpush3.msra.mxu1 %v319_v2  ;;  %v497_v17 = vunpack.c.0.s8 %v496_v12  ;;  %s2491_s12 = smov 64   ;;  %s2492_s18 = smov 48  }
  0x3c   : > { %2176 = vmatprep.subr.mxu1 %v2479_v0  ;;  %v2689_v18 = vsub.s32 %v433_v14, %v2686_v13  ;;  %s2493_s15 = smov 40   ;;  %s2089_s19 = sshll.u32 %s2638_s8, 5 }
  0x3d   : > { %2177 = vmatpush3.msra.mxu1 %v318_v3  ;;  %v2692_v25 = vsub.s32 %v497_v17, %v2686_v13  ;;  %p3010_p12 = scmp.ne.s32.totalorder %s3004_s13, 0 }
  0x3e   : > { %2178 = vmatprep.subr.mxu1 %v2479_v0 }
  0x3f   : > { %2179 = vmatpush3.msra.mxu1 %v317_v4 }
  0x40   : > { %2181 = vmatmul.mubr.msk.f32.vlgmr.msra.gmra.mxu1 %vm321_vm1, %v2668_v5  ;;  %2183 = vmatprep.subr.mxu1 %v2479_v0 }
  0x41   : > { %2185 = vmatprep.mubr.msk.f32.mxu1 %vm2480_vm0, %v2479_v0 }
 0x100   : > { %v2676_v6 = vpop.f32.mrf.mxu1 }
 0x101   : > { %411 = vrot.lane.b32.xlu1 %v2676_v6, %s2481_s21  ;;  %405 = vrot.lane.b32.xlu0 %v2676_v6, %s2482_s9  ;;  %s2775_s21 = scalar_lea.vmem [#allocation6], %s2089_s19  ;;  %s2496_s19 = smov 24  }
 0x102   : > { %v2182_v7 = vpop.f32.mrf.mxu1 }
 0x105   : > { %414 = vrot.lane.b32.xlu1 %v2676_v6, %s2483_s11  ;;  %408 = vrot.lane.b32.xlu0 %v2676_v6, %s2484_s23  ;;  %s2131_s23 = sshll.u32 %s2561_s28, 9 }
 0x109   : > { %399 = vrot.lane.b32.xlu1 %v2676_v6, %s2485_s20  ;;  %396 = vrot.lane.b32.xlu0 %v2676_v6, %s2486_s22  ;;  %s1976_s20 = sshll.u32 %s2775_s21, 4  ;;  %s2921_s20 = int_to_ptr.vmem [resolvable:$true] %s1976_s20 }
 0x10d   : > { %402 = vrot.lane.b32.xlu0 %v2676_v6, %s2487_s29 }
 0x173   : > { %v412_v15 = vpop.permute.xlu1 %411  ;;  %v406_v16 = vpop.permute.xlu0 %405 }
 0x174   : > { %v461_v19 = vcombine.low %v406_v16, %v412_v15  ;;  %v462_v20 = vcombine.high %v406_v16, %v412_v15 }
 0x176   : > { %v469_v26 = vrot.slane %v461_v19, %v2689_v18  ;;  %v476_v27 = vrot.slane %v462_v20, %v2689_v18 }
 0x177   : > { %v415_v21 = vpop.permute.xlu1 %414  ;;  %v409_v22 = vpop.permute.xlu0 %408 }
 0x178   : > { %v477_v23 = vcombine.low %v409_v22, %v415_v21  ;;  %v478_v24 = vcombine.high %v409_v22, %v415_v21 }
 0x17a   : > { %v485_v28 = vrot.slane %v477_v23, %v2689_v18  ;;  %v492_v29 = vrot.slane %v478_v24, %v2689_v18 }
 0x17b   : > { %v397_v30 = vpop.permute.xlu0 %396  ;;  %v400_v35 = vpop.permute.xlu1 %399 }
 0x17c   : > { %v525_v31 = vcombine.low %v469_v26, %v485_v28  ;;  %v526_v32 = vcombine.high %v469_v26, %v485_v28  ;;  %v541_v33 = vcombine.low %v476_v27, %v492_v29  ;;  %v542_v34 = vcombine.high %v476_v27, %v492_v29 }
 0x17d   : > { %v429_v40 = vcombine.low %v2676_v6, %v400_v35  ;;  %v430_v41 = vcombine.high %v2676_v6, %v400_v35 }
 0x17e   : > { %v533_v36 = vrot.slane %v525_v31, %v2692_v25  ;;  %v540_v37 = vrot.slane %v526_v32, %v2692_v25  ;;  %v549_v38 = vrot.slane %v541_v33, %v2692_v25  ;;  %v556_v39 = vrot.slane %v542_v34, %v2692_v25 }
 0x17f   : > { %v403_v42 = vpop.permute.xlu0 %402  ;;  %v437_v53 = vrot.slane %v429_v40, %v2689_v18  ;;  %v444_v54 = vrot.slane %v430_v41, %v2689_v18  ;;  %v309_v40 = vand.u32 127, %v306_v8 }
 0x180   : > { %v2092_v43 = vcombine.low %v533_v36, %v540_v37  ;;  %v2094_v44 = vcombine.high %v533_v36, %v540_v37  ;;  %v2096_v45 = vcombine.low %v549_v38, %v556_v39  ;;  %v2098_v46 = vcombine.high %v549_v38, %v556_v39 }
 0x181   : > { %v445_v47 = vcombine.low %v397_v30, %v403_v42  ;;  %v446_v48 = vcombine.high %v397_v30, %v403_v42  ;;  %vm310_vm3 = vcmp.gt.s32.totalorder %v309_v40, %v2686_v13 }
 0x182   : > { %v648_v49 = vrot.slane %v2092_v43, %v2689_v18  ;;  %v664_v50 = vrot.slane %v2094_v44, %v2689_v18  ;;  %v680_v51 = vrot.slane %v2096_v45, %v2689_v18  ;;  %v696_v52 = vrot.slane %v2098_v46, %v2689_v18 }
 0x183   : > { %v453_v55 = vrot.slane %v445_v47, %v2689_v18  ;;  %v460_v56 = vrot.slane %v446_v48, %v2689_v18 }
 0x184   : > { %v713_v57 = vcombine.low %v648_v49, %v664_v50  ;;  %v745_v58 = vcombine.low %v680_v51, %v696_v52  ;;  %v714_v59 = vcombine.high %v648_v49, %v664_v50  ;;  %v746_v60 = vcombine.high %v680_v51, %v696_v52 }
 0x185   : > { %v493_v61 = vcombine.low %v437_v53, %v453_v55  ;;  %v494_v62 = vcombine.high %v437_v53, %v453_v55  ;;  %v509_v63 = vcombine.low %v444_v54, %v460_v56  ;;  %v510_v1 = vcombine.high %v444_v54, %v460_v56 }
 0x186   : > { %v721_v2 = vrot.slane %v713_v57, %v2692_v25  ;;  %v753_v3 = vrot.slane %v745_v58, %v2692_v25  ;;  %v728_v4 = vrot.slane %v714_v59, %v2692_v25  ;;  %v760_v7 = vrot.slane %v746_v60, %v2692_v25 }
 0x187   : > { %v501_v9 = vrot.slane %v493_v61, %v2692_v25  ;;  %v508_v10 = vrot.slane %v494_v62, %v2692_v25  ;;  %v517_v11 = vrot.slane %v509_v63, %v2692_v25  ;;  %v524_v12 = vrot.slane %v510_v1, %v2692_v25 }
 0x188   : > { %v765_v14 = vcombine.low %v721_v2, %v753_v3  ;;  %v767_v15 = vcombine.low %v728_v4, %v760_v7  ;;  %v766_v36 = vcombine.high %v721_v2, %v753_v3  ;;  %v768_v38 = vcombine.high %v728_v4, %v760_v7 }
 0x189   : > { %v2091_v16 = vcombine.low %v501_v9, %v508_v10  ;;  %v2093_v17 = vcombine.high %v501_v9, %v508_v10  ;;  %v2095_v19 = vcombine.low %v517_v11, %v524_v12  ;;  %v2097_v20 = vcombine.high %v517_v11, %v524_v12 }
 0x18a   : > { %2184 = vmatpush3.xpose.msk.msra.mxu1 %vm837_vm2, %v765_v14  ;;  %2194 = vmatpush3.xpose.msk.msra.mxu0 %vm837_vm2, %v767_v15 }
 0x18b   : > { %v641_v21 = vrot.slane %v2091_v16, %v2689_v18  ;;  %v657_v22 = vrot.slane %v2093_v17, %v2689_v18  ;;  %v673_v23 = vrot.slane %v2095_v19, %v2689_v18  ;;  %v689_v24 = vrot.slane %v2097_v20, %v2689_v18  ;;  %2188 = vmatprep.subr.mxu1 %v2479_v0 }
 0x18c   : > { %2203 = vmatprep.subr.mxu0 %v2479_v0 }
 0x18d   : > { %v697_v26 = vcombine.low %v641_v21, %v657_v22  ;;  %v729_v27 = vcombine.low %v673_v23, %v689_v24  ;;  %v698_v28 = vcombine.high %v641_v21, %v657_v22  ;;  %v730_v29 = vcombine.high %v673_v23, %v689_v24 }
 0x18f   : > { %v705_v30 = vrot.slane %v697_v26, %v2692_v25  ;;  %v737_v31 = vrot.slane %v729_v27, %v2692_v25  ;;  %v712_v32 = vrot.slane %v698_v28, %v2692_v25  ;;  %v744_v33 = vrot.slane %v730_v29, %v2692_v25 }
 0x191   : > { %v761_v34 = vcombine.low %v705_v30, %v737_v31  ;;  %v763_v35 = vcombine.low %v712_v32, %v744_v33  ;;  %v762_v37 = vcombine.high %v705_v30, %v737_v31  ;;  %v764_v39 = vcombine.high %v712_v32, %v744_v33 }
 0x193   : > { %2186 = vmatmul.mubr.msk.f32.vlgmr.msra.gmra.mxu1 %vm837_vm2, %v761_v34  ;;  %2196 = vmatmul.mubr.msk.f32.vlgmr.msra.gmra.mxu0 %vm837_vm2, %v763_v35 }
 0x194   : > { %2189 = vmatpush3.xpose.msk.msra.mxu1 %vm837_vm2, %v766_v36  ;;  %2190 = vmatprep.mubr.msk.f32.mxu1 %vm2480_vm0, %v2479_v0 }
 0x195   : > { %2198 = vmatprep.subr.mxu1 %v2479_v0  ;;  %2205 = vmatprep.mubr.msk.f32.mxu0 %vm2480_vm0, %v2479_v0 }
 0x197   : > { %2191 = vmatmul.mubr.msk.f32.vlgmr.msra.gmra.mxu1 %vm837_vm2, %v762_v37 }
 0x198   : > { %2199 = vmatpush3.xpose.msk.msra.mxu1 %vm837_vm2, %v768_v38  ;;  %2200 = vmatprep.mubr.msk.f32.mxu1 %vm2480_vm0, %v2479_v0 }
 0x199   : > { %2208 = vmatprep.subr.mxu1 %v2479_v0 }
 0x19b   : > { %2201 = vmatmul.mubr.msk.f32.vlgmr.msra.gmra.mxu1 %vm837_vm2, %v764_v39 }
 0x19c   : > { %2210 = vmatprep.mubr.msk.f32.mxu1 %vm2480_vm0, %v2479_v0 }
 0x253   : > { %v910_v41 = vpop.f32.mrf.mxu1  ;;  %v1062_v42 = vpop.f32.mrf.mxu0 }
 0x254   : > { %v1142_v43 = vmul.f32 0.35355338, %v910_v41  ;;  %v1144_v49 = vmul.f32 0.35355338, %v1062_v42 }
 0x255   : > { %v2187_v44 = vpop.f32.mrf.mxu1  ;;  %v2197_v45 = vpop.f32.mrf.mxu0 }
 0x256   : > { %v1148_v46 = vsel %vm310_vm3, -1e+30, %v1142_v43  ;;  %v1150_v55 = vsel %vm310_vm3, -1e+30, %v1144_v49 }
 0x257   : > { %v986_v47 = vpop.f32.mrf.mxu1  ;;  %v1152_v48 = vsel %vm837_vm2, %v1148_v46, -inf  ;;  %v1158_v58 = vsel %vm837_vm2, %v1150_v55, -inf }
 0x258   : > { %v1143_v50 = vmul.f32 0.35355338, %v986_v47  ;;  %1153 = vmax.xlane.f32.xlu1 %v1152_v48 }
 0x259   : > { %v2192_v51 = vpop.f32.mrf.mxu1 }
 0x25a   : > { %v1149_v8 = vsel %vm310_vm3, -1e+30, %v1143_v50 }
 0x25b   : > { %v1138_v52 = vpop.f32.mrf.mxu1  ;;  %v1155_v53 = vsel %vm837_vm2, %v1149_v8, -inf }
 0x25c   : > { %v1145_v54 = vmul.f32 0.35355338, %v1138_v52  ;;  %1156 = vmax.xlane.f32.xlu0 %v1155_v53 }
 0x25d   : > { %v2202_v56 = vpop.f32.mrf.mxu1 }
 0x25e   : > { %v1151_v57 = vsel %vm310_vm3, -1e+30, %v1145_v54 }
 0x25f   : > { %v1161_v59 = vsel %vm837_vm2, %v1151_v57, -inf }
 0x260   : > { %1159 = vmax.xlane.f32.xlu0 %v1158_v58  ;;  %1162 = vmax.xlane.f32.xlu1 %v1161_v59 }
 0x271   : > { %420 = vrot.lane.b32.xlu1 %v2676_v6, %s2490_s17  ;;  %s2919_s17 = scalar_lea.hbm %s2998_s7, %s2131_s23 }
 0x276   : > { %417 = vrot.lane.b32.xlu0 %v2676_v6, %s2491_s12  ;;  %s1950_s12 = scalar_lea.sflag [#allocation7], %s2638_s8 }
 0x2e1   : > { %v1154_v60 = vpop.xlane.xlu1 %1153 }
 0x2e2   : > { %v1164_v61 = vsub.f32 %v1148_v46, %v1154_v60 }
 0x2e4   : > { %v1168_v62 = vmul.f32 1.442695, %v1164_v61 }
 0x2e5   : > { %v1157_v63 = vpop.xlane.xlu0 %1156 }
 0x2e6   : > { %2334 = vpow2.f32 %v1168_v62  ;;  %v1165_v1 = vsub.f32 %v1149_v8, %v1157_v63 }
 0x2e8   : > { %v1170_v13 = vmul.f32 1.442695, %v1165_v1 }
 0x2e9   : > { %v1160_v2 = vpop.xlane.xlu0 %1159  ;;  %v1163_v3 = vpop.xlane.xlu1 %1162 }
 0x2ea   : > { %2336 = vpow2.f32 %v1170_v13  ;;  %v1166_v4 = vsub.f32 %v1150_v55, %v1160_v2  ;;  %v1167_v7 = vsub.f32 %v1151_v57, %v1163_v3 }
 0x2ec   : > { %v1172_v9 = vmul.f32 1.442695, %v1166_v4  ;;  %v1174_v10 = vmul.f32 1.442695, %v1167_v7 }
 0x2ed   : > { %v418_v21 = vpop.permute.xlu0 %417  ;;  %v421_v22 = vpop.permute.xlu1 %420 }
 0x2ee   : > { %2338 = vpow2.f32 %v1172_v9 }
 0x2ef   : > { %2340 = vpow2.f32 %v1174_v10 }
 0x2f3   : > { %v2335_v11 = vpop.eup %2334 }
 0x2f4   : > { %v1176_v12 = vsel %vm837_vm2, %v2335_v11, 0.0 }
 0x2f5   : > { %1177 = vadd.xlane.f32.xlu0 %v1176_v12 }
 0x2f7   : > { %v2337_v14 = vpop.eup %2336 }
 0x2f8   : > { %v1179_v15 = vsel %vm837_vm2, %v2337_v14, 0.0 }
 0x2f9   : > { %1180 = vadd.xlane.f32.xlu1 %v1179_v15 }
 0x2fb   : > { %v2339_v16 = vpop.eup %2338 }
 0x2fc   : > { %v2341_v17 = vpop.eup %2340  ;;  %v1182_v19 = vsel %vm837_vm2, %v2339_v16, 0.0 }
 0x2fd   : > { %1183 = vadd.xlane.f32.xlu0 %v1182_v19  ;;  %v1185_v20 = vsel %vm837_vm2, %v2341_v17, 0.0 }
 0x2fe   : > { %1186 = vadd.xlane.f32.xlu1 %v1185_v20 }
 0x30f   : > { %423 = vrot.lane.b32.xlu1 %v2676_v6, %s2492_s18  ;;  %s2494_s18 = smov 16  }
 0x313   : > { %426 = vrot.lane.b32.xlu0 %v2676_v6, %s2493_s15  ;;  %s2495_s15 = smov 8  }
 0x37e   : > { %v1178_v23 = vpop.xlane.xlu0 %1177 }
 0x37f   : > { %2342 = vrcp.f32 %v1178_v23 }
 0x382   : > { %v1181_v24 = vpop.xlane.xlu1 %1180 }
 0x383   : > { %2344 = vrcp.f32 %v1181_v24 }
 0x386   : > { %v1184_v26 = vpop.xlane.xlu0 %1183 }
 0x387   : > { %2346 = vrcp.f32 %v1184_v26  ;;  %v1187_v27 = vpop.xlane.xlu1 %1186 }
 0x388   : > { %2348 = vrcp.f32 %v1187_v27 }
 0x38a   : > { %v427_v28 = vpop.permute.xlu0 %426 }
 0x38b   : > { %v581_v29 = vcombine.low %v421_v22, %v427_v28  ;;  %v582_v30 = vcombine.high %v421_v22, %v427_v28  ;;  %v424_v31 = vpop.permute.xlu1 %423 }
 0x38c   : > { %v2343_v32 = vpop.eup %2342  ;;  %v565_v33 = vcombine.low %v418_v21, %v424_v31  ;;  %v566_v34 = vcombine.high %v418_v21, %v424_v31 }
 0x38d   : > { %v589_v6 = vrot.slane %v581_v29, %v2689_v18  ;;  %v596_v35 = vrot.slane %v582_v30, %v2689_v18  ;;  %v1196_v36 = vmul.f32 %v2343_v32, %v2335_v11  ;;  %v1652_v11 = vld [vmem:[%s2993_s2 + $0x18] sm:$0xff] }
 0x38e   : > { %v573_v37 = vrot.slane %v565_v33, %v2689_v18  ;;  %v580_v38 = vrot.slane %v566_v34, %v2689_v18 }
 0x38f   : > { %1200 = vst.msk [vmem:[%s2775_s21] sm:$0xff] %vm837_vm2, %v1196_v36 }
 0x390   : > { %v2345_v39 = vpop.eup %2344  ;;  %v597_v40 = vcombine.low %v573_v37, %v589_v6  ;;  %v598_v41 = vcombine.high %v573_v37, %v589_v6  ;;  %v613_v42 = vcombine.low %v580_v38, %v596_v35  ;;  %v614_v43 = vcombine.high %v580_v38, %v596_v35  ;;  %v1651_v6 = vld [vmem:[%s2993_s2 + $0x10] sm:$0xff]  ;;  %v1650_v35 = vld [vmem:[%s2993_s2 + $0x8] sm:$0xff] }
 0x391   : > { %v1197_v44 = vmul.f32 %v2345_v39, %v2337_v14 }
 0x392   : > { %v605_v45 = vrot.slane %v597_v40, %v2692_v25  ;;  %v612_v46 = vrot.slane %v598_v41, %v2692_v25  ;;  %v621_v47 = vrot.slane %v613_v42, %v2692_v25  ;;  %v628_v48 = vrot.slane %v614_v43, %v2692_v25 }
 0x393   : > { %1201 = vst.msk [vmem:[%s2775_s21 + $0x8] sm:$0xff] %vm837_vm2, %v1197_v44 }
 0x394   : > { %v2347_v49 = vpop.eup %2346  ;;  %v769_v50 = vcombine.low %v605_v45, %v612_v46  ;;  %v2099_v51 = vcombine.high %v605_v45, %v612_v46  ;;  %v785_v8 = vcombine.low %v621_v47, %v628_v48  ;;  %v2100_v52 = vcombine.high %v621_v47, %v628_v48 }
 0x395   : > { %v2349_v53 = vpop.eup %2348  ;;  %v1198_v54 = vmul.f32 %v2347_v49, %v2339_v16 }
 0x396   : > { %v776_v55 = vrot.slane %v769_v50, %v2689_v18  ;;  %v784_v56 = vrot.slane %v2099_v51, %v2689_v18  ;;  %v792_v57 = vrot.slane %v785_v8, %v2689_v18  ;;  %v800_v58 = vrot.slane %v2100_v52, %v2689_v18 }
 0x397   : > { %1202 = vst.msk [vmem:[%s2775_s21 + $0x10] sm:$0xff] %vm837_vm2, %v1198_v54  ;;  %v1199_v59 = vmul.f32 %v2349_v53, %v2341_v17 }
 0x398   : > { %v801_v60 = vcombine.low %v776_v55, %v784_v56  ;;  %v817_v61 = vcombine.low %v792_v57, %v800_v58  ;;  %v802_v62 = vcombine.high %v776_v55, %v784_v56  ;;  %v818_v63 = vcombine.high %v792_v57, %v800_v58 }
 0x399   : > { %1203 = vst.msk [vmem:[%s2775_s21 + $0x18] sm:$0xff] %vm837_vm2, %v1199_v59 }
 0x39a   : > { %v809_v1 = vrot.slane %v801_v60, %v2692_v25  ;;  %v825_v13 = vrot.slane %v817_v61, %v2692_v25  ;;  %v816_v2 = vrot.slane %v802_v62, %v2692_v25  ;;  %v832_v3 = vrot.slane %v818_v63, %v2692_v25 }
 0x39c   : > { %v833_v4 = vcombine.low %v809_v1, %v825_v13  ;;  %v834_v7 = vcombine.high %v809_v1, %v825_v13  ;;  %v835_v9 = vcombine.low %v816_v2, %v832_v3  ;;  %v836_v10 = vcombine.high %v816_v2, %v832_v3 }
 0x39e   : > { %2204 = vmatpush3.msra.mxu0 %v833_v4  ;;  %2209 = vmatpush3.msra.mxu1 %v834_v7 }
 0x39f   : > { %2206 = vmatmul.mubr.msk.f32.vlgmr.msra.gmra.mxu0 %vm837_vm2, %v1196_v36  ;;  %2211 = vmatmul.mubr.msk.f32.vlgmr.msra.gmra.mxu1 %vm837_vm2, %v1197_v44  ;;  %v1649_v44 = vld [vmem:[%s2993_s2] sm:$0xff] }
 0x3a0   : > { %2213 = vmatprep.subr.mxu0 %v2479_v0  ;;  %2218 = vmatprep.subr.mxu1 %v2479_v0 }
 0x3a1   : > { %2214 = vmatpush3.msra.mxu0 %v835_v9  ;;  %2219 = vmatpush3.msra.mxu1 %v836_v10 }
 0x3a2   : > { %2215 = vmatprep.mubr.msk.f32.mxu0 %vm2480_vm0, %v2479_v0  ;;  %2220 = vmatprep.mubr.msk.f32.mxu1 %vm2480_vm0, %v2479_v0 }
 0x3a3   : > { %2216 = vmatmul.mubr.msk.f32.vlgmr.msra.gmra.mxu0 %vm837_vm2, %v1198_v54  ;;  %2221 = vmatmul.mubr.msk.f32.vlgmr.msra.gmra.mxu1 %vm837_vm2, %v1199_v59 }
 0x3a4   : > { %2223 = vmatprep.subr.mxu0 %v2479_v0  ;;  %2231 = vmatprep.mubr.msk.f32.mxu0 %vm2480_vm0, %v2479_v0 }
 0x3a5   : > { %2234 = vmatprep.subr.mxu1 %v2479_v0  ;;  %2242 = vmatprep.mubr.msk.f32.mxu1 %vm2480_vm0, %v2479_v0 }
 0x3a6   : > { %2224 = vmatpush3.msra.mxu0 %v1652_v11 }
 0x3a7   : > { %2225 = vmatprep.subr.mxu0 %v2479_v0 }
 0x3a8   : > { %2226 = vmatpush3.msra.mxu0 %v1651_v6  ;;  %v2118_v6 = vld [vmem:[%s2996_s5] ss:$0 sm:$0xff] }
 0x3a9   : > { %2227 = vmatprep.subr.mxu0 %v2479_v0 }
 0x3aa   : > { %2228 = vmatpush3.msra.mxu0 %v1650_v35 }
 0x3ab   : > { %2229 = vmatprep.subr.mxu0 %v2479_v0 }
 0x3ac   : > { %2230 = vmatpush3.msra.mxu0 %v1649_v44 }
 0x3ad   : > { %2245 = vmatprep.subr.mxu0 %v2479_v0 }
 0x45f   : > { %v1273_v12 = vpop.f32.mrf.mxu0  ;;  %v1346_v14 = vpop.f32.mrf.mxu1 }
 0x461   : > { %v2207_v15 = vpop.f32.mrf.mxu0  ;;  %v2212_v16 = vpop.f32.mrf.mxu1 }
 0x462   : > { %v1751_v15 = vld [vmem:[%s2994_s3] sm:$0xff]  ;;  %v1840_v16 = vld [vmem:[%s2995_s4 + $0x38] sm:$0xff] }
 0x463   : > { %v1419_v17 = vpop.f32.mrf.mxu0  ;;  %v1492_v19 = vpop.f32.mrf.mxu1 }
 0x464   : > { %v1496_v20 = vcombine.low %v1273_v12, %v1419_v17  ;;  %v1497_v21 = vcombine.high %v1273_v12, %v1419_v17  ;;  %v1512_v22 = vcombine.low %v1346_v14, %v1492_v19  ;;  %v1513_v23 = vcombine.high %v1346_v14, %v1492_v19  ;;  %v1754_v12 = vld [vmem:[%s2994_s3 + $0x18] sm:$0xff]  ;;  %v1752_v14 = vld [vmem:[%s2994_s3 + $0x8] sm:$0xff]  ;;  %v1839_v17 = vld [vmem:[%s2995_s4 + $0x30] sm:$0xff] }
 0x465   : > { %v2217_v24 = vpop.f32.mrf.mxu0  ;;  %v2222_v26 = vpop.f32.mrf.mxu1  ;;  %2235 = vmatpush3.msra.mxu1 %v1754_v12  ;;  %v1838_v19 = vld [vmem:[%s2995_s4 + $0x28] sm:$0xff] }
 0x466   : > { %v1504_v27 = vrot.slane %v1496_v20, %v2689_v18  ;;  %v1511_v28 = vrot.slane %v1497_v21, %v2689_v18  ;;  %v1520_v29 = vrot.slane %v1512_v22, %v2689_v18  ;;  %v1527_v30 = vrot.slane %v1513_v23, %v2689_v18  ;;  %2236 = vmatprep.subr.mxu1 %v2479_v0  ;;  %v1837_v20 = vld [vmem:[%s2995_s4 + $0x20] sm:$0xff]  ;;  %v1836_v21 = vld [vmem:[%s2995_s4 + $0x18] sm:$0xff] }
 0x468   : > { %v1528_v31 = vcombine.low %v1504_v27, %v1520_v29  ;;  %v1529_v32 = vcombine.high %v1504_v27, %v1520_v29  ;;  %v1544_v33 = vcombine.low %v1511_v28, %v1527_v30  ;;  %v1545_v34 = vcombine.high %v1511_v28, %v1527_v30  ;;  %v2116_v27 = vld [vmem:[%s2996_s5 + $0x2] ss:$0 sm:$0xff]  ;;  %v2117_v29 = vld [vmem:[%s2996_s5 + $0x3] ss:$0 sm:$0xff] }
 0x46a   : > { %v1536_v36 = vrot.slane %v1528_v31, %v2692_v25  ;;  %v1543_v37 = vrot.slane %v1529_v32, %v2692_v25  ;;  %v1552_v38 = vrot.slane %v1544_v33, %v2692_v25  ;;  %v1559_v39 = vrot.slane %v1545_v34, %v2692_v25  ;;  %v1835_v32 = vld [vmem:[%s2995_s4 + $0x10] sm:$0xff]  ;;  %v1834_v33 = vld [vmem:[%s2995_s4 + $0x8] sm:$0xff]  ;;  %v1833_v34 = vld [vmem:[%s2995_s4] sm:$0xff] }
 0x46c   : > { %v1564_v40 = vcombine.low %v1536_v36, %v1543_v37  ;;  %v2113_v41 = vcombine.high %v1536_v36, %v1543_v37  ;;  %v1580_v42 = vcombine.low %v1552_v38, %v1559_v39  ;;  %v2114_v43 = vcombine.high %v1552_v38, %v1559_v39  ;;  %v2120_v39 = vld [vmem:[%s2996_s5 + $0x1] ss:$0 sm:$0xff] }
 0x46e   : > { %v1571_v45 = vrot.slane %v1564_v40, %v2689_v18  ;;  %v1579_v46 = vrot.slane %v2113_v41, %v2689_v18  ;;  %v1587_v47 = vrot.slane %v1580_v42, %v2689_v18  ;;  %v1595_v48 = vrot.slane %v2114_v43, %v2689_v18 }
 0x470   : > { %v1597_v49 = vcombine.high %v1571_v45, %v1579_v46  ;;  %v1613_v50 = vcombine.high %v1587_v47, %v1595_v48  ;;  %v1596_v51 = vcombine.low %v1571_v45, %v1579_v46  ;;  %v1612_v8 = vcombine.low %v1587_v47, %v1595_v48 }
 0x472   : > { %v1611_v52 = vrot.slane %v1597_v49, %v2692_v25  ;;  %v1627_v53 = vrot.slane %v1613_v50, %v2692_v25  ;;  %v1604_v54 = vrot.slane %v1596_v51, %v2692_v25  ;;  %v1620_v55 = vrot.slane %v1612_v8, %v2692_v25 }
 0x474   : > { %v1630_v56 = vcombine.low %v1611_v52, %v1627_v53  ;;  %v1629_v57 = vcombine.high %v1604_v54, %v1620_v55  ;;  %v1628_v58 = vcombine.low %v1604_v54, %v1620_v55  ;;  %v1631_v18 = vcombine.high %v1611_v52, %v1627_v53 }
 0x476   : > { %1637 = vrot.lane.b32.xlu0 %v1630_v56, %s2494_s18  ;;  %1633 = vrot.lane.b32.xlu1 %v1629_v57, %s2495_s15  ;;  %s2382_s18 = scalar_lea.vmem %s2921_s20, 512 }
 0x477   : > { %p2383_p11 = scmp.ne.s32.totalorder %s2921_s20, %s2382_s18 }
 0x479   : > { %p2384_p13 = pnand %p2383_p11, %p3010_p12 }
 0x47a   : > { %1641 = vrot.lane.b32.xlu1 %v1631_v18, %s2496_s19  ;;  %s2497_s19 = smov [#allocation6]  }
 0x47b   : > { %p2385_p1 = pneg %p2384_p13  ;;  %s2386_s9 = sshll.u32 %s2497_s19, 4  ;;  %s2387_s9 = int_to_ptr.vmem [resolvable:$false] %s2386_s9 }
 0x47c   : > { %s2388_s21 = scalar_lea.vmem %s2387_s9, 1024  ;;  %p2389_p3 = scmp.lt.s32.totalorder %s2921_s20, %s2387_s9 }
 0x47d   : > { %p2390_p5 = scmp.lt.s32.totalorder %s2388_s21, %s2382_s18 }
 0x47f   : > { %p2391_p8 = por %p2390_p5, %p2389_p3 }
 0x481   : > { %p2392_p10 = pnand %p2391_p8, %p2385_p1 }
 0x4e8   : > { %v1634_v59 = vpop.permute.xlu1 %1633  ;;  %v1638_v60 = vpop.permute.xlu0 %1637 }
 0x4e9   : > { %v1644_v61 = vsel %vm837_vm2, %v1628_v58, %v1634_v59 }
 0x4ea   : > { %v1646_v63 = vsel %vm1645_vm4, %v1644_v61, %v1638_v60 }
 0x4ec   : > { %v1642_v62 = vpop.permute.xlu1 %1641 }
 0x4ed   : > { %v1648_v25 = vsel %vm1647_vm5, %v1646_v63, %v1642_v62 }
 0x4ee   : > { %2232 = vmatmul.mubr.msk.f32.vlgmr.msra.gmra.mxu0 %vm321_vm1, %v1648_v25 }
 0x4ef   : > { %2261 = vmatprep.mubr.msk.f32.mxu0 %vm2480_vm0, %v2479_v0  ;;  %2246 = vmatpush3.msra.mxu0 %v1840_v16 }
 0x4f0   : > { %2247 = vmatprep.subr.mxu0 %v2479_v0 }
 0x4f1   : > { %2248 = vmatpush3.msra.mxu0 %v1839_v17 }
 0x4f2   : > { %2249 = vmatprep.subr.mxu0 %v2479_v0 }
 0x4f3   : > { %2250 = vmatpush3.msra.mxu0 %v1838_v19 }
 0x4f4   : > { %2251 = vmatprep.subr.mxu0 %v2479_v0 }
 0x4f5   : > { %2252 = vmatpush3.msra.mxu0 %v1837_v20 }
 0x4f6   : > { %2253 = vmatprep.subr.mxu0 %v2479_v0 }
 0x4f7   : > { %2254 = vmatpush3.msra.mxu0 %v1836_v21 }
 0x4f8   : > { %2255 = vmatprep.subr.mxu0 %v2479_v0 }
 0x4f9   : > { %2256 = vmatpush3.msra.mxu0 %v1835_v32 }
 0x4fa   : > { %2257 = vmatprep.subr.mxu0 %v2479_v0 }
 0x4fb   : > { %2258 = vmatpush3.msra.mxu0 %v1834_v33 }
 0x4fc   : > { %2259 = vmatprep.subr.mxu0 %v2479_v0 }
 0x4fd   : > { %2260 = vmatpush3.msra.mxu0 %v1833_v34 }
 0x5ae   : > { %v1722_v1 = vpop.f32.mrf.mxu0 }
 0x5af   : > { %v1726_v13 = vadd.f32 %v1722_v1, %v2668_v5  ;;  %v1753_v5 = vld [vmem:[%s2994_s3 + $0x10] sm:$0xff] }
 0x5b0   : > { %v2233_v2 = vpop.f32.mrf.mxu0  ;;  %2237 = vmatpush3.msra.mxu1 %v1753_v5 }
 0x5b1   : > { %v1727_v3 = vsel %vm321_vm1, %v1726_v13, 0.0  ;;  %2238 = vmatprep.subr.mxu1 %v2479_v0 }
 0x5b2   : > { %1728 = vadd.xlane.f32.xlu0 %v1727_v3  ;;  %2239 = vmatpush3.msra.mxu1 %v1752_v14 }
 0x5b3   : > { %2240 = vmatprep.subr.mxu1 %v2479_v0 }
 0x5b4   : > { %2241 = vmatpush3.msra.mxu1 %v1751_v15 }
 0x63b   : > { %v1729_v4 = vpop.xlane.xlu0 %1728 }
 0x63c   : > { %v1731_v7 = vmul.f32 0.03125, %v1729_v4 }
 0x63e   : > { %v1732_v9 = vsub.f32 %v1726_v13, %v1731_v7 }
 0x640   : > { %v1733_v10 = vmul.f32 %v1732_v9, %v1732_v9 }
 0x642   : > { %v1734_v11 = vsel %vm321_vm1, %v1733_v10, 0.0 }
 0x643   : > { %1735 = vadd.xlane.f32.xlu1 %v1734_v11 }
 0x6cc   : > { %v1736_v22 = vpop.xlane.xlu1 %1735 }
 0x6cd   : > { %v1737_v23 = vmul.f32 0.03125, %v1736_v22 }
 0x6cf   : > { %v1738_v24 = vadd.f32 1e-05, %v1737_v23 }
 0x6d1   : > { %2350 = vrsqrt.f32 %v1738_v24 }
 0x6de   : > { %v2351_v26 = vpop.eup %2350 }
 0x6df   : > { %v1740_v28 = vmul.f32 %v2351_v26, %v1732_v9 }
 0x6e1   : > { %v1745_v30 = vmul.f32 %v2116_v27, %v1740_v28 }
 0x6e3   : > { %v1750_v31 = vadd.f32 %v2117_v29, %v1745_v30 }
 0x6e5   : > { %2243 = vmatmul.mubr.msk.f32.vlgmr.msra.gmra.mxu1 %vm321_vm1, %v1750_v31 }
 0x7a5   : > { %v1828_v35 = vpop.f32.mrf.mxu1 }
 0x7a6   : > { %v1829_v36 = vadd.f32 %v2118_v6, %v1828_v35 }
 0x7a7   : > { %v2244_v37 = vpop.f32.mrf.mxu1 }
 0x7a8   : > { %v1832_v38 = vmax.f32 %v1829_v36, 0.0 }
 0x7aa   : > { %2262 = vmatmul.mubr.msk.f32.vlgmr.msra.gmra.mxu0 %vm1845_vm6, %v1832_v38 }
 0x86a   : > { %v1915_v40 = vpop.f32.mrf.mxu0 }
 0x86b   : > { %v1916_v0 = vadd.f32 %v2120_v39, %v1915_v40 }
 0x86c   : > { %v2263_v41 = vpop.f32.mrf.mxu0 }
 0x86d   : > { %v1919_v42 = vadd.f32 %v1916_v0, %v1750_v31 }
 0x86f   : > { %v1920_v43 = vsel %vm321_vm1, %v1919_v42, 0.0 }
 0x870   : > { %1921 = vadd.xlane.f32.xlu0 %v1920_v43 }
 0x8f9   : > { %v1922_v44 = vpop.xlane.xlu0 %1921 }
 0x8fa   : > { %v1923_v45 = vmul.f32 0.03125, %v1922_v44 }
 0x8fc   : > { %v1924_v46 = vsub.f32 %v1919_v42, %v1923_v45 }
 0x8fe   : > { %v1925_v47 = vmul.f32 %v1924_v46, %v1924_v46 }
 0x900   : > { %v1926_v48 = vsel %vm321_vm1, %v1925_v47, 0.0 }
 0x901   : > { %1927 = vadd.xlane.f32.xlu0 %v1926_v48 }
 0x902   : > { %2395 = shalt.err (!%p2392_p10)
}
 0x903   : > { %s2396_s11 = scalar_lea.hbm %s2919_s17, 512  ;;  %s2400_s29 = scalar_lea.hbm %s2998_s7, 1024 }
 0x904   : > { %p2397_p2 = scmp.ne.s32.totalorder %s2919_s17, %s2396_s11  ;;  %p2401_p7 = scmp.lt.s32.totalorder %s2919_s17, %s2998_s7 }
 0x905   : > { %p2402_p0 = scmp.lt.s32.totalorder %s2400_s29, %s2396_s11 }
 0x906   : > { %p2398_p4 = pnand %p2397_p2, %p3010_p12 }
 0x907   : > { %p2403_p6 = por %p2402_p0, %p2401_p7 }
 0x908   : > { %p2399_p9 = pneg %p2398_p4 }
 0x90a   : > { %p2404_p11 = pnand %p2403_p6, %p2399_p9 }
 0x90c   : > { %2407 = shalt.err (!%p2404_p11)
}
 0x90d   : > { %s2498_s18 = smov 128   ;;  %v2122_v52 = vld [vmem:[%s2996_s5 + $0x4] ss:$0 sm:$0xff]  ;;  %v2123_v54 = vld [vmem:[%s2996_s5 + $0x5] ss:$0 sm:$0xff]  ;;  %s2126_s23 = sshll.u32 %s2561_s28, 7 }
 0x90e   : > { %2267 = dma.vmem_to_hbm [thread:$0]  (%p3010_p12), %s2921_s20, 512, %s2919_s17, %s1950_s12, %s2498_s18, %s2498_s18, %s2495_s15  }
 0x90f   : > { %s3011_s22 = sshll.u32 %s2638_s8, 3  ;;  %s1961_s12 = scalar_lea.hbm %s2997_s6, %s2126_s23 }
 0x910   : > { %s297_s29 = scalar_lea.vmem [#allocation5], %s3011_s22  ;;  %s1945_s19 = scalar_lea.sflag [#allocation4], %s2638_s8 }
 0x911   : > { %s1963_s15 = sshll.u32 %s297_s29, 4  ;;  %s2499_s16 = smov [#allocation5]   ;;  %s1964_s15 = int_to_ptr.vmem [resolvable:$true] %s1963_s15 }
 0x912   : > { %s2408_s18 = scalar_lea.vmem %s1964_s15, 128  ;;  %s2412_s28 = sshll.u32 %s2499_s16, 4  ;;  %s2413_s28 = int_to_ptr.vmem [resolvable:$false] %s2412_s28 }
 0x913   : > { %p2409_p13 = scmp.ne.s32.totalorder %s1964_s15, %s2408_s18  ;;  %s2414_s9 = scalar_lea.vmem %s2413_s28, 256 }
 0x914   : > { %p2415_p5 = scmp.lt.s32.totalorder %s1964_s15, %s2413_s28  ;;  %p2416_p8 = scmp.lt.s32.totalorder %s2414_s9, %s2408_s18 }
 0x915   : > { %p2410_p1 = pnand %p2409_p13, %p3010_p12 }
 0x916   : > { %p2417_p10 = por %p2416_p8, %p2415_p5 }
 0x917   : > { %p2411_p3 = pneg %p2410_p1 }
 0x919   : > { %p2418_p2 = pnand %p2417_p10, %p2411_p3 }
 0x98a   : > { %v1928_v49 = vpop.xlane.xlu0 %1927 }
 0x98b   : > { %v1929_v50 = vmul.f32 0.03125, %v1928_v49 }
 0x98d   : > { %v1930_v51 = vadd.f32 1e-05, %v1929_v50 }
 0x98f   : > { %2352 = vrsqrt.f32 %v1930_v51 }
 0x99c   : > { %v2353_v8 = vpop.eup %2352 }
 0x99d   : > { %v1932_v53 = vmul.f32 %v2353_v8, %v1924_v46 }
 0x99f   : > { %v1937_v55 = vmul.f32 %v2122_v52, %v1932_v53 }
 0x9a1   : > { %v1942_v56 = vadd.f32 %v2123_v54, %v1937_v55 }
 0x9a3   : > { %1943 = vst.msk [vmem:[%s297_s29] sm:$0xff] %vm321_vm1, %v1942_v56 }
 0x9a4   : > { %2421 = shalt.err (!%p2418_p2)
}
 0x9a5   : > { %s2422_s21 = scalar_lea.hbm %s1961_s12, 128  ;;  %s2426_s23 = scalar_lea.hbm %s2997_s6, 256 }
 0x9a6   : > { %p2423_p4 = scmp.ne.s32.totalorder %s1961_s12, %s2422_s21  ;;  %p2427_p0 = scmp.lt.s32.totalorder %s1961_s12, %s2997_s6 }
 0x9a7   : > { %p2428_p6 = scmp.lt.s32.totalorder %s2426_s23, %s2422_s21 }
 0x9a8   : > { %p2424_p9 = pnand %p2423_p4, %p3010_p12 }
 0x9a9   : > { %p2429_p11 = por %p2428_p6, %p2427_p0 }
 0x9aa   : > { %p2425_p7 = pneg %p2424_p9 }
 0x9ac   : > { %p2430_p13 = pnand %p2429_p11, %p2425_p7 }
 0x9ae   : > { %2433 = shalt.err (!%p2430_p13)
}
 0x9af   : > { %2266 = dma.vmem_to_hbm [thread:$0]  (%p3010_p12), %s1964_s15, 128, %s1961_s12, %s1945_s19  }
 0x9b0 PF: > { %s1991_s20 = sand.u32 1, %s2464_s24   ;;  %p3012_p1 = scmp.ne.s32.totalorder %s3005_s14, 0 }
 0x9b1   : > { %p3013_p3 = scmp.ge.s32.totalorder %s2476_s27, 2  ;;  %s1992_s17 = scalar_lea.sflag [#allocation4], %s1991_s20 }
 0x9b3   : > { %p2275_p5 = pnand %p3013_p3, %p3012_p1 }
 0x9b5   : > { %p2276_p8 = pneg %p2275_p5 }
 0x9b7   : > { %2455 = dma.done.wait (%p2276_p8), %s1992_s17, 128  }
 0x9b8   : > { %2457 = vsyncadd (%p2276_p8), %s1992_s17, 4294967168  ;;  %s2001_s18 = scalar_lea.sflag [#allocation7], %s1991_s20 }
 0x9b9   : > { %2459 = dma.done.wait (%p2276_p8), %s2001_s18, 512  }
 0x9ba   : > { %2461 = vsyncadd (%p2276_p8), %s2001_s18, 4294966784  ;;  %p24_p12 = scmp.ge.s32.totalorder %s2565_s30, 4   ;;  %s3014_s24 = smov %s2468_s25 }
 0x9bb   : > { %s3015_s25 = smov %s2472_s26  ;;  %s3016_s26 = smov %s2577_s10 }
 0x9bc   : > { %s3017_s27 = smov %s2565_s30  ;;  %26 = sbr.rel (!%p24_p12) target bundleno = 7 (0x7), region = 106 }
 0x9c1   :  { %2006 = vsyncpa [#allocation3], 1 }
 0x9c2   :  { %2008 = vsyncpa [#allocation3 + $0x1], 1 }
 0x9c3   :  { %2009 = vsyncpa [#allocation4], 1 }
 0x9c4   :  { %2011 = vsyncpa [#allocation4 + $0x1], 1 }
 0x9c5   :  { %2012 = vsyncpa [#allocation7], 1 }
 0x9c6   :  { %2014 = vsyncpa [#allocation7 + $0x1], 1 }

</bundles_post_ra>
